<compile_context>
chip_gen: v7x
topology: tpu7x:2x2x1
jax: 0.10.0
libtpu: 0.0.40
codegen_flags: <defaults>
</compile_context>

<pallas_src>
import jax
import jax.numpy as jnp
from jax.experimental import pallas as pl
from jax.experimental.pallas import tpu as pltpu

EPS = 1e-5
LANE = 128
M_ALIGN = 16   # sublane alignment safe for both f32 (8,128) and bf16 (16,128)


def _round_up(x, m):
    return (x + m - 1) // m * m


# ---------------------------------------------------------------------------
# Pallas kernel: tiled matmul + BN affine + (shortcut) + (ReLU) + (pre output)
# ---------------------------------------------------------------------------
def _make_kernel(relu, res_mode, emit_pre):
    """res_mode in {None, 'add', 'proj'}."""

    def kernel(*refs):
        i = 0
        x_ref, w_ref, s_ref, b_ref = refs[i:i + 4]
        i += 4
        r_ref = xs_ref = ws_ref = ss_ref = bs_ref = None
        if res_mode == "add":
            r_ref = refs[i]
            i += 1
        elif res_mode == "proj":
            xs_ref, ws_ref, ss_ref, bs_ref = refs[i:i + 4]
            i += 4
        out_ref = refs[i]
        i += 1
        pre_ref = None
        if emit_pre:
            pre_ref = refs[i]
            i += 1
        acc_ref = refs[i]

        kstep = pl.program_id(2)

        @pl.when(kstep == 0)
        def _():
            acc_ref[...] = jnp.zeros_like(acc_ref)

        acc_ref[...] += jnp.dot(x_ref[...], w_ref[...],
                                preferred_element_type=jnp.float32)

        @pl.when(kstep == pl.num_programs(2) - 1)
        def _():
            y = acc_ref[...] * s_ref[...] + b_ref[...]
            if res_mode == "add":
                y = y + r_ref[...]
            elif res_mode == "proj":
                # fused 1x1-conv projection shortcut + its BN affine
                sc = jnp.dot(xs_ref[...], ws_ref[...],
                             preferred_element_type=jnp.float32)
                y = y + sc * ss_ref[...] + bs_ref[...]
            if emit_pre:
                pre_ref[...] = y.astype(pre_ref.dtype)
            if relu:
                y = jnp.maximum(y, 0.0)
            out_ref[...] = y.astype(out_ref.dtype)

    return kernel


def fused_conv_bn_act(x_cols, w_mat, scale, bias, *,
                      residual_rows=None, proj=None,
                      relu=True, emit_pre=False, out_dtype=jnp.float32,
                      tm_max=256, tn_max=256, tk_max=512):
    """out[:m,:n] = act((x_cols @ w_mat) * scale + bias [+ shortcut])."""
    m, k = x_cols.shape
    _, n = w_mat.shape

    # Tile sizes: 16-sublane-aligned M tile, lane-aligned (128) K/N tiles.
    tm = min(tm_max, _round_up(m, M_ALIGN))
    tn = min(tn_max, _round_up(n, LANE))
    tk = min(tk_max, _round_up(k, LANE))
    mp, kp, np_ = _round_up(m, tm), _round_up(k, tk), _round_up(n, tn)

    # bf16 MXU inputs (f32 accumulation inside the kernel); zero padding.
    xb = jnp.pad(x_cols, ((0, mp - m), (0, kp - k))).astype(jnp.bfloat16)
    wb = jnp.pad(w_mat, ((0, kp - k), (0, np_ - n))).astype(jnp.bfloat16)
    sp = jnp.pad(scale.astype(jnp.float32), ((0, 0), (0, np_ - n)))
    bp = jnp.pad(bias.astype(jnp.float32), ((0, 0), (0, np_ - n)))

    inputs = [xb, wb, sp, bp]
    in_specs = [
        pl.BlockSpec((tm, tk), lambda i, j, kk: (i, kk)),
        pl.BlockSpec((tk, tn), lambda i, j, kk: (kk, j)),
        pl.BlockSpec((1, tn), lambda i, j, kk: (0, j)),
        pl.BlockSpec((1, tn), lambda i, j, kk: (0, j)),
    ]

    res_mode = None
    extra_bytes = 0
    proj_flops = 0
    if residual_rows is not None:
        res_mode = "add"
        rp = jnp.pad(residual_rows.astype(jnp.float32),
                     ((0, mp - m), (0, np_ - n)))
        inputs.append(rp)
        in_specs.append(pl.BlockSpec((tm, tn), lambda i, j, kk: (i, j)))
        extra_bytes = rp.size * 4
    elif proj is not None:
        res_mode = "proj"
        xs_cols, ws_mat, ss, bs = proj
        ms, ks = xs_cols.shape
        assert ms == m and ws_mat.shape[1] == n
        ksp = _round_up(ks, LANE)
        xsb = jnp.pad(xs_cols, ((0, mp - m), (0, ksp - ks))).astype(jnp.bfloat16)
        wsb = jnp.pad(ws_mat, ((0, ksp - ks), (0, np_ - n))).astype(jnp.bfloat16)
        ssp = jnp.pad(ss.astype(jnp.float32), ((0, 0), (0, np_ - n)))
        bsp = jnp.pad(bs.astype(jnp.float32), ((0, 0), (0, np_ - n)))
        inputs += [xsb, wsb, ssp, bsp]
        in_specs += [
            pl.BlockSpec((tm, ksp), lambda i, j, kk: (i, 0)),
            pl.BlockSpec((ksp, tn), lambda i, j, kk: (0, j)),
            pl.BlockSpec((1, tn), lambda i, j, kk: (0, j)),
            pl.BlockSpec((1, tn), lambda i, j, kk: (0, j)),
        ]
        extra_bytes = xsb.size * 2 + wsb.size * 2 + (ssp.size + bsp.size) * 4
        proj_flops = 2 * mp * ksp * np_

    out_spec = pl.BlockSpec((tm, tn), lambda i, j, kk: (i, j))
    out_bytes = mp * np_ * jnp.dtype(out_dtype).itemsize
    if emit_pre:
        out_shape = (jax.ShapeDtypeStruct((mp, np_), out_dtype),
                     jax.ShapeDtypeStruct((mp, np_), jnp.float32))
        out_specs = (out_spec, out_spec)
        out_bytes += mp * np_ * 4
    else:
        out_shape = jax.ShapeDtypeStruct((mp, np_), out_dtype)
        out_specs = out_spec

    grid = (mp // tm, np_ // tn, kp // tk)
    bytes_accessed = (xb.size * 2 + wb.size * 2 + (sp.size + bp.size) * 4
                      + extra_bytes + out_bytes)
    cost = pl.CostEstimate(flops=2 * mp * kp * np_ + proj_flops,
                           transcendentals=0, bytes_accessed=bytes_accessed)

    out = pl.pallas_call(
        _make_kernel(relu, res_mode, emit_pre),
        out_shape=out_shape,
        grid_spec=pltpu.PrefetchScalarGridSpec(
            num_scalar_prefetch=0,
            grid=grid,
            in_specs=in_specs,
            out_specs=out_specs,
            scratch_shapes=[pltpu.VMEM((tm, tn), jnp.float32)]),
        compiler_params=pltpu.CompilerParams(
            dimension_semantics=("parallel", "parallel", "arbitrary"),
            vmem_limit_bytes=32 * 1024 * 1024),
        cost_estimate=cost,
    )(*inputs)

    if emit_pre:
        o, p = out
        return o[:m, :n], p[:m, :n]
    return out[:m, :n]


# ---------------------------------------------------------------------------
# JAX glue: im2col, weight reshaping, BN folding, parameter init
# ---------------------------------------------------------------------------
def im2col(x_nhwc, k, stride, pad):
    n, h, w, c = x_nhwc.shape
    xp = jnp.pad(x_nhwc, ((0, 0), (pad, pad), (pad, pad), (0, 0)))
    ho = (h + 2 * pad - k) // stride + 1
    wo = (w + 2 * pad - k) // stride + 1
    cols = []
    for ky in range(k):
        for kx in range(k):
            patch = xp[:, ky:ky + stride * ho:stride, kx:kx + stride * wo:stride, :]
            cols.append(patch)
    cols = jnp.concatenate(cols, axis=-1)          # (N, Ho, Wo, k*k*C)
    return cols.reshape(n * ho * wo, k * k * c), (n, ho, wo)


def conv_w_to_mat(w_oihw):
    # (Cout, Cin, kh, kw) -> (kh*kw*Cin, Cout), matching im2col column ordering
    cout, cin, kh, kw = w_oihw.shape
    return jnp.transpose(w_oihw, (2, 3, 1, 0)).reshape(kh * kw * cin, cout)


def fold_bn(bn):
    scale = bn["gamma"] / jnp.sqrt(bn["var"] + EPS)
    bias = bn["beta"] - bn["mean"] * scale
    return (scale.reshape(1, -1).astype(jnp.float32),
            bias.reshape(1, -1).astype(jnp.float32))


def init_bn(key, c):
    k1, k2, k3, k4 = jax.random.split(key, 4)
    return {
        "gamma": 0.5 + jax.random.uniform(k1, (c,), jnp.float32),
        "beta": 0.1 * jax.random.normal(k2, (c,), jnp.float32),
        "mean": 0.1 * jax.random.normal(k3, (c,), jnp.float32),
        "var": 0.5 + jax.random.uniform(k4, (c,), jnp.float32),
    }


def init_params(key, in_planes, planes, stride):
    ks = jax.random.split(key, 6)
    params = {
        "conv1_w": 0.1 * jax.random.normal(ks[0], (planes, in_planes, 3, 3), jnp.float32),
        "bn1": init_bn(ks[1], planes),
        "conv2_w": 0.1 * jax.random.normal(ks[2], (planes, planes, 3, 3), jnp.float32),
        "bn2": init_bn(ks[3], planes),
    }
    if stride != 1 or in_planes != planes:
        params["convs_w"] = 0.1 * jax.random.normal(ks[4], (planes, in_planes, 1, 1), jnp.float32)
        params["bns"] = init_bn(ks[5], planes)
    return params


# ---------------------------------------------------------------------------
# BasicBlock forward (wrapper around the Pallas kernels)
# ---------------------------------------------------------------------------
def basic_block_forward(x_nchw, params, in_planes, planes, stride, is_last):
    n, cin, h, w = x_nchw.shape
    assert cin == in_planes
    x_nhwc = jnp.transpose(x_nchw, (0, 2, 3, 1)).astype(jnp.float32)

    # conv1 -> bn1 -> relu  (intermediate kept in bf16: it only feeds the MXU)
    cols1, (nn_, ho, wo) = im2col(x_nhwc, 3, stride, 1)
    s1, b1 = fold_bn(params["bn1"])
    out1_rows = fused_conv_bn_act(cols1, conv_w_to_mat(params["conv1_w"]),
                                  s1, b1, relu=True, out_dtype=jnp.bfloat16)
    out1 = out1_rows.reshape(nn_, ho, wo, planes)

    # conv2 -> bn2 -> (+ shortcut) -> relu : single fused kernel
    cols2, _ = im2col(out1, 3, 1, 1)
    s2, b2 = fold_bn(params["bn2"])

    if stride != 1 or in_planes != planes:
        # projection shortcut (1x1 conv, stride s, no pad) fused into epilogue
        xs = x_nhwc[:, ::stride, ::stride, :]
        cols_s = xs.reshape(-1, in_planes)
        ws = jnp.transpose(params["convs_w"], (2, 3, 1, 0)).reshape(in_planes, planes)
        ss, bs = fold_bn(params["bns"])
        res = fused_conv_bn_act(cols2, conv_w_to_mat(params["conv2_w"]), s2, b2,
                                proj=(cols_s, ws, ss, bs),
                                relu=True, emit_pre=is_last)
    else:
        short_rows = x_nhwc.reshape(-1, in_planes)
        res = fused_conv_bn_act(cols2, conv_w_to_mat(params["conv2_w"]), s2, b2,
                                residual_rows=short_rows,
                                relu=True, emit_pre=is_last)

    if is_last:
        out_rows, pre_rows = res
        out = jnp.transpose(out_rows.reshape(nn_, ho, wo, planes), (0, 3, 1, 2))
        pre = jnp.transpose(pre_rows.reshape(nn_, ho, wo, planes), (0, 3, 1, 2))
        return out, pre
    return jnp.transpose(res.reshape(nn_, ho, wo, planes), (0, 3, 1, 2))


# ---------------------------------------------------------------------------
# Pure-JAX reference (same bf16-input / f32-accumulate precision choice)
# ---------------------------------------------------------------------------
def ref_forward(x, params, in_planes, planes, stride, is_last):
    def conv(x_, w_, s_, pad):
        return jax.lax.conv_general_dilated(
            x_.astype(jnp.bfloat16), w_.astype(jnp.bfloat16), (s_, s_),
            ((pad, pad), (pad, pad)),
            dimension_numbers=("NCHW", "OIHW", "NCHW"),
            preferred_element_type=jnp.float32)

    def bn(x_, p):
        sc = p["gamma"] / jnp.sqrt(p["var"] + EPS)
        bi = p["beta"] - p["mean"] * sc
        return x_ * sc[None, :, None, None] + bi[None, :, None, None]

    out = jax.nn.relu(bn(conv(x, params["conv1_w"], stride, 1), params["bn1"]))
    out = bn(conv(out, params["conv2_w"], 1, 1), params["bn2"])
    if stride != 1 or in_planes != planes:
        sc_ = bn(conv(x, params["convs_w"], stride, 0), params["bns"])
    else:
        sc_ = x
    pre = out + sc_
    out = jax.nn.relu(pre)
    return (out, pre) if is_last else out


if __name__ == "__main__":
    key = jax.random.PRNGKey(0)
    kx, kp1, kp2 = jax.random.split(key, 3)
    x = jax.random.normal(kx, (2, 4, 16, 16), jnp.float32)

    fwd = jax.jit(basic_block_forward, static_argnums=(2, 3, 4, 5))

    # Case 1: identity shortcut, is_last=True (returns (out, preact))
    p1 = init_params(kp1, in_planes=4, planes=4, stride=1)
    out1, pre1 = fwd(x, p1, 4, 4, 1, True)
    jax.block_until_ready((out1, pre1))
    ro1, rp1 = ref_forward(x, p1, 4, 4, 1, True)
    assert out1.shape == (2, 4, 16, 16) and pre1.shape == (2, 4, 16, 16)
    assert jnp.allclose(out1, ro1, atol=1e-2, rtol=1e-2)
    assert jnp.allclose(pre1, rp1, atol=1e-2, rtol=1e-2)

    # Case 2: projection shortcut (stride=2, channel change), is_last=False
    p2 = init_params(kp2, in_planes=4, planes=8, stride=2)
    out2 = fwd(x, p2, 4, 8, 2, False)
    jax.block_until_ready(out2)
    ro2 = ref_forward(x, p2, 4, 8, 2, False)
    assert out2.shape == (2, 8, 8, 8)
    assert jnp.allclose(out2, ro2, atol=1e-2, rtol=1e-2)

    # Case 3: projection shortcut + is_last=True (exercises fused proj + pre)
    out3, pre3 = fwd(x, p2, 4, 8, 2, True)
    jax.block_until_ready((out3, pre3))
    ro3, rp3 = ref_forward(x, p2, 4, 8, 2, True)
    assert out3.shape == (2, 8, 8, 8) and pre3.shape == (2, 8, 8, 8)
    assert jnp.allclose(out3, ro3, atol=1e-2, rtol=1e-2)
    assert jnp.allclose(pre3, rp3, atol=1e-2, rtol=1e-2)

    print("KERNEL_OK")
</pallas_src>

<mosaic_0001>
module attributes {stable_mosaic.version = 11 : i64} {
  func.func @kernel(%arg0: i32, %arg1: i32, %arg2: i32, %arg3: memref<256x128xbf16, #tpu.memory_space<vmem>>, %arg4: memref<128x128xbf16, #tpu.memory_space<vmem>>, %arg5: memref<1x128xf32, #tpu.memory_space<vmem>>, %arg6: memref<1x128xf32, #tpu.memory_space<vmem>>, %arg7: memref<256x128xbf16, #tpu.memory_space<vmem>>, %arg8: memref<256x128xf32, #tpu.memory_space<vmem>>) attributes {dimension_semantics = [#tpu.dimension_semantics<parallel>, #tpu.dimension_semantics<parallel>, #tpu.dimension_semantics<arbitrary>], iteration_bounds = array<i64: 2, 1, 1>, scalar_prefetch = 0 : i64, scratch_operands = 1 : i64, tpu.core_type = #tpu.core_type<tc>, window_params = [{transform_indices = @transform_0, window_bounds = array<i64: 256, 128>}, {transform_indices = @transform_1, window_bounds = array<i64: 128, 128>}, {transform_indices = @transform_2, window_bounds = array<i64: 1, 128>}, {transform_indices = @transform_3, window_bounds = array<i64: 1, 128>}, {transform_indices = @transform_4, window_bounds = array<i64: 256, 128>}]} {
    %c0_i32 = arith.constant 0 : i32
    %0 = arith.cmpi eq, %arg2, %c0_i32 : i32
    %1 = arith.extui %0 : i1 to i32
    %c0_i32_0 = arith.constant 0 : i32
    %2 = arith.cmpi ne, %1, %c0_i32_0 : i32
    scf.if %2 {
      %cst_10 = arith.constant 0.000000e+00 : f32
      %12 = vector.broadcast %cst_10 : f32 to vector<256x128xf32>
      %c0_11 = arith.constant 0 : index
      %c0_12 = arith.constant 0 : index
      %13 = vector.load %arg8[%c0_11, %c0_12] : memref<256x128xf32, #tpu.memory_space<vmem>>, vector<256x128xf32>
      tpu.vector_store %arg8[%c0_11, %c0_12], %12 {strides = array<i32>} : memref<256x128xf32, #tpu.memory_space<vmem>>, vector<256x128xf32>,
    } else {
    }
    %c0 = arith.constant 0 : index
    %c0_1 = arith.constant 0 : index
    %3 = vector.load %arg8[%c0, %c0_1] : memref<256x128xf32, #tpu.memory_space<vmem>>, vector<256x128xf32>
    %c0_2 = arith.constant 0 : index
    %c0_3 = arith.constant 0 : index
    %4 = vector.load %arg3[%c0_2, %c0_3] : memref<256x128xbf16, #tpu.memory_space<vmem>>, vector<256x128xbf16>
    %c0_4 = arith.constant 0 : index
    %c0_5 = arith.constant 0 : index
    %5 = vector.load %arg4[%c0_4, %c0_5] : memref<128x128xbf16, #tpu.memory_space<vmem>>, vector<128x128xbf16>
    %cst = arith.constant dense<0.000000e+00> : vector<256x128xf32>
    %6 = tpu.matmul %4, %5, %cst {dimension_numbers = #tpu.dot_dimension_numbers<[1], [0], [0], [1], [0, 0, 1, 1], [], []>} : vector<256x128xbf16>, vector<128x128xbf16>, vector<256x128xf32> -> vector<256x128xf32>
    %7 = arith.addf %3, %6 : vector<256x128xf32>
    %c0_6 = arith.constant 0 : index
    %c0_7 = arith.constant 0 : index
    %8 = vector.load %arg8[%c0_6, %c0_7] : memref<256x128xf32, #tpu.memory_space<vmem>>, vector<256x128xf32>
    tpu.vector_store %arg8[%c0_6, %c0_7], %7 {strides = array<i32>} : memref<256x128xf32, #tpu.memory_space<vmem>>, vector<256x128xf32>,
    %c0_i32_8 = arith.constant 0 : i32
    %9 = arith.cmpi eq, %arg2, %c0_i32_8 : i32
    %10 = arith.extui %9 : i1 to i32
    %c0_i32_9 = arith.constant 0 : i32
    %11 = arith.cmpi ne, %10, %c0_i32_9 : i32
    scf.if %11 {
      %c0_10 = arith.constant 0 : index
      %c0_11 = arith.constant 0 : index
      %12 = vector.load %arg8[%c0_10, %c0_11] : memref<256x128xf32, #tpu.memory_space<vmem>>, vector<256x128xf32>
      %c0_12 = arith.constant 0 : index
      %c0_13 = arith.constant 0 : index
      %13 = vector.load %arg5[%c0_12, %c0_13] : memref<1x128xf32, #tpu.memory_space<vmem>>, vector<1x128xf32>
      %14 = vector.broadcast %13 : vector<1x128xf32> to vector<256x128xf32>
      %15 = arith.mulf %12, %14 : vector<256x128xf32>
      %c0_14 = arith.constant 0 : index
      %c0_15 = arith.constant 0 : index
      %16 = vector.load %arg6[%c0_14, %c0_15] : memref<1x128xf32, #tpu.memory_space<vmem>>, vector<1x128xf32>
      %17 = vector.broadcast %16 : vector<1x128xf32> to vector<256x128xf32>
      %18 = arith.addf %15, %17 : vector<256x128xf32>
      %cst_16 = arith.constant 0.000000e+00 : f32
      %19 = vector.broadcast %cst_16 : f32 to vector<256x128xf32>
      %20 = arith.maximumf %18, %19 : vector<256x128xf32>
      %21 = arith.truncf %20 : vector<256x128xf32> to vector<256x128xbf16>
      %c0_17 = arith.constant 0 : index
      %c0_18 = arith.constant 0 : index
      %22 = vector.load %arg7[%c0_17, %c0_18] : memref<256x128xbf16, #tpu.memory_space<vmem>>, vector<256x128xbf16>
      tpu.vector_store %arg7[%c0_17, %c0_18], %21 {strides = array<i32>} : memref<256x128xbf16, #tpu.memory_space<vmem>>, vector<256x128xbf16>,
    } else {
    }
    return
  }
  func.func @transform_0(%arg0: i32, %arg1: i32, %arg2: i32) -> (i32, i32) {
    %c0_i32 = arith.constant 0 : i32
    return %arg0, %arg2 : i32, i32
  }
  func.func @transform_1(%arg0: i32, %arg1: i32, %arg2: i32) -> (i32, i32) {
    %c0_i32 = arith.constant 0 : i32
    return %arg2, %arg1 : i32, i32
  }
  func.func @transform_2(%arg0: i32, %arg1: i32, %arg2: i32) -> (i32, i32) {
    %c0_i32 = arith.constant 0 : i32
    %c0_i32_0 = arith.constant 0 : i32
    return %c0_i32, %arg1 : i32, i32
  }
  func.func @transform_3(%arg0: i32, %arg1: i32, %arg2: i32) -> (i32, i32) {
    %c0_i32 = arith.constant 0 : i32
    %c0_i32_0 = arith.constant 0 : i32
    return %c0_i32, %arg1 : i32, i32
  }
  func.func @transform_4(%arg0: i32, %arg1: i32, %arg2: i32) -> (i32, i32) {
    %c0_i32 = arith.constant 0 : i32
    return %arg0, %arg1 : i32, i32
  }
}

module attributes {stable_mosaic.version = 11 : i64} {
  func.func @kernel(%arg0: i32, %arg1: i32, %arg2: i32, %arg3: memref<256x128xbf16, #tpu.memory_space<vmem>>, %arg4: memref<128x128xbf16, #tpu.memory_space<vmem>>, %arg5: memref<1x128xf32, #tpu.memory_space<vmem>>, %arg6: memref<1x128xf32, #tpu.memory_space<vmem>>, %arg7: memref<256x128xf32, #tpu.memory_space<vmem>>, %arg8: memref<256x128xf32, #tpu.memory_space<vmem>>, %arg9: memref<256x128xf32, #tpu.memory_space<vmem>>, %arg10: memref<256x128xf32, #tpu.memory_space<vmem>>) attributes {dimension_semantics = [#tpu.dimension_semantics<parallel>, #tpu.dimension_semantics<parallel>, #tpu.dimension_semantics<arbitrary>], iteration_bounds = array<i64: 2, 1, 1>, scalar_prefetch = 0 : i64, scratch_operands = 1 : i64, tpu.core_type = #tpu.core_type<tc>, window_params = [{transform_indices = @transform_0, window_bounds = array<i64: 256, 128>}, {transform_indices = @transform_1, window_bounds = array<i64: 128, 128>}, {transform_indices = @transform_2, window_bounds = array<i64: 1, 128>}, {transform_indices = @transform_3, window_bounds = array<i64: 1, 128>}, {transform_indices = @transform_4, window_bounds = array<i64: 256, 128>}, {transform_indices = @transform_5, window_bounds = array<i64: 256, 128>}, {transform_indices = @transform_6, window_bounds = array<i64: 256, 128>}]} {
    %c0_i32 = arith.constant 0 : i32
    %0 = arith.cmpi eq, %arg2, %c0_i32 : i32
    %1 = arith.extui %0 : i1 to i32
    %c0_i32_0 = arith.constant 0 : i32
    %2 = arith.cmpi ne, %1, %c0_i32_0 : i32
    scf.if %2 {
      %cst_10 = arith.constant 0.000000e+00 : f32
      %12 = vector.broadcast %cst_10 : f32 to vector<256x128xf32>
      %c0_11 = arith.constant 0 : index
      %c0_12 = arith.constant 0 : index
      %13 = vector.load %arg10[%c0_11, %c0_12] : memref<256x128xf32, #tpu.memory_space<vmem>>, vector<256x128xf32>
      tpu.vector_store %arg10[%c0_11, %c0_12], %12 {strides = array<i32>} : memref<256x128xf32, #tpu.memory_space<vmem>>, vector<256x128xf32>,
    } else {
    }
    %c0 = arith.constant 0 : index
    %c0_1 = arith.constant 0 : index
    %3 = vector.load %arg10[%c0, %c0_1] : memref<256x128xf32, #tpu.memory_space<vmem>>, vector<256x128xf32>
    %c0_2 = arith.constant 0 : index
    %c0_3 = arith.constant 0 : index
    %4 = vector.load %arg3[%c0_2, %c0_3] : memref<256x128xbf16, #tpu.memory_space<vmem>>, vector<256x128xbf16>
    %c0_4 = arith.constant 0 : index
    %c0_5 = arith.constant 0 : index
    %5 = vector.load %arg4[%c0_4, %c0_5] : memref<128x128xbf16, #tpu.memory_space<vmem>>, vector<128x128xbf16>
    %cst = arith.constant dense<0.000000e+00> : vector<256x128xf32>
    %6 = tpu.matmul %4, %5, %cst {dimension_numbers = #tpu.dot_dimension_numbers<[1], [0], [0], [1], [0, 0, 1, 1], [], []>} : vector<256x128xbf16>, vector<128x128xbf16>, vector<256x128xf32> -> vector<256x128xf32>
    %7 = arith.addf %3, %6 : vector<256x128xf32>
    %c0_6 = arith.constant 0 : index
    %c0_7 = arith.constant 0 : index
    %8 = vector.load %arg10[%c0_6, %c0_7] : memref<256x128xf32, #tpu.memory_space<vmem>>, vector<256x128xf32>
    tpu.vector_store %arg10[%c0_6, %c0_7], %7 {strides = array<i32>} : memref<256x128xf32, #tpu.memory_space<vmem>>, vector<256x128xf32>,
    %c0_i32_8 = arith.constant 0 : i32
    %9 = arith.cmpi eq, %arg2, %c0_i32_8 : i32
    %10 = arith.extui %9 : i1 to i32
    %c0_i32_9 = arith.constant 0 : i32
    %11 = arith.cmpi ne, %10, %c0_i32_9 : i32
    scf.if %11 {
      %c0_10 = arith.constant 0 : index
      %c0_11 = arith.constant 0 : index
      %12 = vector.load %arg10[%c0_10, %c0_11] : memref<256x128xf32, #tpu.memory_space<vmem>>, vector<256x128xf32>
      %c0_12 = arith.constant 0 : index
      %c0_13 = arith.constant 0 : index
      %13 = vector.load %arg5[%c0_12, %c0_13] : memref<1x128xf32, #tpu.memory_space<vmem>>, vector<1x128xf32>
      %14 = vector.broadcast %13 : vector<1x128xf32> to vector<256x128xf32>
      %15 = arith.mulf %12, %14 : vector<256x128xf32>
      %c0_14 = arith.constant 0 : index
      %c0_15 = arith.constant 0 : index
      %16 = vector.load %arg6[%c0_14, %c0_15] : memref<1x128xf32, #tpu.memory_space<vmem>>, vector<1x128xf32>
      %17 = vector.broadcast %16 : vector<1x128xf32> to vector<256x128xf32>
      %18 = arith.addf %15, %17 : vector<256x128xf32>
      %c0_16 = arith.constant 0 : index
      %c0_17 = arith.constant 0 : index
      %19 = vector.load %arg7[%c0_16, %c0_17] : memref<256x128xf32, #tpu.memory_space<vmem>>, vector<256x128xf32>
      %20 = arith.addf %18, %19 : vector<256x128xf32>
      %c0_18 = arith.constant 0 : index
      %c0_19 = arith.constant 0 : index
      %21 = vector.load %arg9[%c0_18, %c0_19] : memref<256x128xf32, #tpu.memory_space<vmem>>, vector<256x128xf32>
      tpu.vector_store %arg9[%c0_18, %c0_19], %20 {strides = array<i32>} : memref<256x128xf32, #tpu.memory_space<vmem>>, vector<256x128xf32>,
      %cst_20 = arith.constant 0.000000e+00 : f32
      %22 = vector.broadcast %cst_20 : f32 to vector<256x128xf32>
      %23 = arith.maximumf %20, %22 : vector<256x128xf32>
      %c0_21 = arith.constant 0 : index
      %c0_22 = arith.constant 0 : index
      %24 = vector.load %arg8[%c0_21, %c0_22] : memref<256x128xf32, #tpu.memory_space<vmem>>, vector<256x128xf32>
      tpu.vector_store %arg8[%c0_21, %c0_22], %23 {strides = array<i32>} : memref<256x128xf32, #tpu.memory_space<vmem>>, vector<256x128xf32>,
    } else {
    }
    return
  }
  func.func @transform_0(%arg0: i32, %arg1: i32, %arg2: i32) -> (i32, i32) {
    %c0_i32 = arith.constant 0 : i32
    return %arg0, %arg2 : i32, i32
  }
  func.func @transform_1(%arg0: i32, %arg1: i32, %arg2: i32) -> (i32, i32) {
    %c0_i32 = arith.constant 0 : i32
    return %arg2, %arg1 : i32, i32
  }
  func.func @transform_2(%arg0: i32, %arg1: i32, %arg2: i32) -> (i32, i32) {
    %c0_i32 = arith.constant 0 : i32
    %c0_i32_0 = arith.constant 0 : i32
    return %c0_i32, %arg1 : i32, i32
  }
  func.func @transform_3(%arg0: i32, %arg1: i32, %arg2: i32) -> (i32, i32) {
    %c0_i32 = arith.constant 0 : i32
    %c0_i32_0 = arith.constant 0 : i32
    return %c0_i32, %arg1 : i32, i32
  }
  func.func @transform_4(%arg0: i32, %arg1: i32, %arg2: i32) -> (i32, i32) {
    %c0_i32 = arith.constant 0 : i32
    return %arg0, %arg1 : i32, i32
  }
  func.func @transform_5(%arg0: i32, %arg1: i32, %arg2: i32) -> (i32, i32) {
    %c0_i32 = arith.constant 0 : i32
    return %arg0, %arg1 : i32, i32
  }
  func.func @transform_6(%arg0: i32, %arg1: i32, %arg2: i32) -> (i32, i32) {
    %c0_i32 = arith.constant 0 : i32
    return %arg0, %arg1 : i32, i32
  }
}

</mosaic_0001>

<bundles_post_ra>
// kernel: basic_block_forward.2
= control target key start
LH: loop header
LB: loop body
LE: loop exit
PB: predicated region body
PF: predicated region fallthrough
CT: control target
= control target key end

     0   :  { %s1598_s15 = smov 0   ;;  %s1600_s16 = smov 0   ;;  %s1772_s0 = inlined_call_operand.vmem [shape: bf16[512,128], index: 0, kind: input, shape index: {}]   ;;  %s1773_s1 = inlined_call_operand.vmem [shape: bf16[128,128], index: 1, kind: input, shape index: {}]   ;;  %s1774_s2 = inlined_call_operand.vmem [shape: f32[1,128], index: 2, kind: input, shape index: {}]   ;;  %s1775_s3 = inlined_call_operand.vmem [shape: f32[1,128], index: 3, kind: input, shape index: {}]   ;;  %s1776_s4 = inlined_call_operand.vmem [shape: bf16[512,128], index: 4, kind: output, shape index: {}]  }
   0x1   :  { %s1602_s17 = smov 0  }
   0x2 LB: > { %s33_s18 = sadd.s32 1, %s1567_s16  ;;  %p1221_p0 = scmp.ge.s32.totalorder %s1571_s17, 1  ;;  %s1571_s17 = sphi %s1602_s17, %s14_s17   ;;  %s1567_s16 = sphi %s1600_s16, %s1778_s16   ;;  %s1563_s15 = sphi %s1598_s15, %s1777_s15  }
   0x3   : > { %p35_p1 = scmp.ge.s32.totalorder %s33_s18, 2  ;;  %p221_p2 = scmp.lt.s32.totalorder %s1571_s17, 3 }
   0x5   : > { %s1780_s18 = smov (%p35_p1, %s33_s18), 0  ;;  %p222_p3 = pnand %p1221_p0, %p221_p2 }
   0x6   : > { %v1525_v0 = vld [vmem:[%s1773_s1] sm:$0xff] (!%p222_p3)   ;;  %s1222_s21 = sshll.u32 (!%p222_p3), %s1563_s15, 5  ;;  %v1526_v1 = vld [vmem:[%s1773_s1 + $0x8] sm:$0xff] (!%p222_p3)   ;;  %v1527_v2 = vld [vmem:[%s1773_s1 + $0x10] sm:$0xff] (!%p222_p3)  }
   0x7   : > { %225 = sbr.rel (%p222_p3) target bundleno = 288 (0x120), region = 36  ;;  %p268_p4 = scmp.lt.s32.totalorder (!%p222_p3), %s1222_s21, 63  ;;  %1437 = vmatprep.subr.bf16.mxu0 (!%p222_p3), %v1525_v0  ;;  %1485 = vmatprep.subr.bf16.mxu1 (!%p222_p3), %v1525_v0  ;;  %v1528_v3 = vld [vmem:[%s1773_s1 + $0x18] sm:$0xff] (!%p222_p3)   ;;  %v1529_v6 = vld [vmem:[%s1773_s1 + $0x20] sm:$0xff] (!%p222_p3)   ;;  %v1530_v7 = vld [vmem:[%s1773_s1 + $0x28] sm:$0xff] (!%p222_p3)  }
   0x8   : > { %1438 = vmatpush3.bf16.msra.mxu0 (!%p222_p3), %v1525_v0  ;;  %1493 = vmatpush3.bf16.msra.mxu1 (!%p222_p3), %v1525_v0  ;;  %v1531_v8 = vld [vmem:[%s1773_s1 + $0x30] sm:$0xff] (!%p222_p3)   ;;  %v1532_v9 = vld [vmem:[%s1773_s1 + $0x38] sm:$0xff] (!%p222_p3)   ;;  %v1669_v24 = vld [vmem:[%s1774_s2] ss:$0 sm:$0xff] (!%p222_p3) }
   0x9   : > { %1439 = vmatprep.subr.bf16.mxu0 (!%p222_p3), %v1526_v1  ;;  %1486 = vmatprep.subr.bf16.mxu1 (!%p222_p3), %v1526_v1  ;;  %v1674_v26 = vld [vmem:[%s1775_s3] ss:$0 sm:$0xff] (!%p222_p3) }
   0xc   : > { %1440 = vmatpush3.bf16.msra.mxu0 (!%p222_p3), %v1526_v1  ;;  %1494 = vmatpush3.bf16.msra.mxu1 (!%p222_p3), %v1526_v1 }
   0xd   : > { %1441 = vmatprep.subr.bf16.mxu0 (!%p222_p3), %v1527_v2  ;;  %1487 = vmatprep.subr.bf16.mxu1 (!%p222_p3), %v1527_v2 }
   0xe   : > { %s1782_s21 = smov (!%p268_p4, %s1222_s21), 63 }
   0xf   : > { %s1223_s26 = sshll.u32 %s1782_s21, 2 }
  0x10   : > { %s1633_s29 = scalar_lea.vmem %s1772_s0, %s1223_s26  ;;  %1442 = vmatpush3.bf16.msra.mxu0 %v1527_v2  ;;  %1495 = vmatpush3.bf16.msra.mxu1 %v1527_v2  ;;  %s1697_s24 = scalar_lea.vmem %s1776_s4, %s1223_s26 }
  0x11   : > { %v1533_v4 = vld [vmem:[%s1633_s29] sm:$0xff]   ;;  %1443 = vmatprep.subr.bf16.mxu0 %v1528_v3  ;;  %1488 = vmatprep.subr.bf16.mxu1 %v1528_v3  ;;  %v1535_v10 = vld [vmem:[%s1633_s29 + $0x8] sm:$0xff]   ;;  %v1537_v12 = vld [vmem:[%s1633_s29 + $0x10] sm:$0xff]  }
  0x12   : > { %v1534_v5 = vld [vmem:[%s1633_s29 + $0x40] sm:$0xff]   ;;  %1453 = vmatprep.mubr.bf16.mxu0 %v1533_v4  ;;  %v1536_v11 = vld [vmem:[%s1633_s29 + $0x48] sm:$0xff]   ;;  %v1538_v13 = vld [vmem:[%s1633_s29 + $0x50] sm:$0xff]  }
  0x13   : > { %1469 = vmatprep.mubr.bf16.mxu1 %v1534_v5  ;;  %v1539_v14 = vld [vmem:[%s1633_s29 + $0x18] sm:$0xff]   ;;  %v1541_v16 = vld [vmem:[%s1633_s29 + $0x20] sm:$0xff]   ;;  %v1543_v18 = vld [vmem:[%s1633_s29 + $0x28] sm:$0xff]  }
  0x14   : > { %1444 = vmatpush3.bf16.msra.mxu0 %v1528_v3  ;;  %1496 = vmatpush3.bf16.msra.mxu1 %v1528_v3  ;;  %v1540_v15 = vld [vmem:[%s1633_s29 + $0x58] sm:$0xff]   ;;  %v1542_v17 = vld [vmem:[%s1633_s29 + $0x60] sm:$0xff]   ;;  %v1544_v19 = vld [vmem:[%s1633_s29 + $0x68] sm:$0xff]  }
  0x15   : > { %1445 = vmatprep.subr.bf16.mxu0 %v1529_v6  ;;  %1489 = vmatprep.subr.bf16.mxu1 %v1529_v6  ;;  %v1545_v20 = vld [vmem:[%s1633_s29 + $0x30] sm:$0xff]   ;;  %v1547_v22 = vld [vmem:[%s1633_s29 + $0x38] sm:$0xff]  }
  0x16   : > { %v1546_v21 = vld [vmem:[%s1633_s29 + $0x70] sm:$0xff]   ;;  %v1548_v23 = vld [vmem:[%s1633_s29 + $0x78] sm:$0xff]  }
  0x18   : > { %1446 = vmatpush3.bf16.msra.mxu0 %v1529_v6  ;;  %1497 = vmatpush3.bf16.msra.mxu1 %v1529_v6 }
  0x19   : > { %1447 = vmatprep.subr.bf16.mxu0 %v1530_v7  ;;  %1490 = vmatprep.subr.bf16.mxu1 %v1530_v7 }
  0x1c   : > { %1448 = vmatpush3.bf16.msra.mxu0 %v1530_v7  ;;  %1498 = vmatpush3.bf16.msra.mxu1 %v1530_v7 }
  0x1d   : > { %1449 = vmatprep.subr.bf16.mxu0 %v1531_v8  ;;  %1491 = vmatprep.subr.bf16.mxu1 %v1531_v8 }
  0x20   : > { %1450 = vmatpush3.bf16.msra.mxu0 %v1531_v8  ;;  %1499 = vmatpush3.bf16.msra.mxu1 %v1531_v8 }
  0x21   : > { %1451 = vmatprep.subr.bf16.mxu0 %v1532_v9  ;;  %1492 = vmatprep.subr.bf16.mxu1 %v1532_v9 }
  0x24   : > { %1452 = vmatpush3.bf16.msra.mxu0 %v1532_v9  ;;  %1500 = vmatpush3.bf16.msra.mxu1 %v1532_v9 }
  0x27   : > { %1454 = vmatmul.mubr.bf16.vlgmr.msra.gmra.mrb[0].mxu0 %v1535_v10  ;;  %1470 = vmatmul.mubr.bf16.vlgmr.msra.gmra.mrb[0].mxu1 %v1536_v11 }
  0x28   : > { %1457 = vmatprep.mubr.bf16.mxu0 %v1537_v12  ;;  %1473 = vmatprep.mubr.bf16.mxu1 %v1538_v13 }
  0x2f   : > { %1458 = vmatmul.mubr.bf16.gmra.mrb[4].mxu0 %v1539_v14  ;;  %1474 = vmatmul.mubr.bf16.gmra.mrb[4].mxu1 %v1540_v15 }
  0x30   : > { %1461 = vmatprep.mubr.bf16.mxu0 %v1541_v16  ;;  %1477 = vmatprep.mubr.bf16.mxu1 %v1542_v17 }
  0x37   : > { %1462 = vmatmul.mubr.bf16.gmra.mrb[8].mxu0 %v1543_v18  ;;  %1478 = vmatmul.mubr.bf16.gmra.mrb[8].mxu1 %v1544_v19 }
  0x38   : > { %1465 = vmatprep.mubr.bf16.mxu0 %v1545_v20  ;;  %1481 = vmatprep.mubr.bf16.mxu1 %v1546_v21 }
  0x3f   : > { %1466 = vmatmul.mubr.bf16.gmra.mrb[12].mxu0 %v1547_v22  ;;  %1482 = vmatmul.mubr.bf16.gmra.mrb[12].mxu1 %v1548_v23 }
  0xfa   : > { %v1455_v25 = vpop.f32.mrb[0].mxu0  ;;  %v1471_v27 = vpop.f32.mrb[0].mxu1 }
  0xfb   : > { %v830_v28 = vmul.f32 %v1455_v25, %v1669_v24  ;;  %v846_v29 = vmul.f32 %v1471_v27, %v1669_v24  ;;  %v595_v30 = vpop.f32.mrb[1].mxu0  ;;  %v659_v31 = vpop.f32.mrb[1].mxu1 }
  0xfc   : > { %v828_v32 = vmul.f32 %v1669_v24, %v595_v30  ;;  %v844_v33 = vmul.f32 %v1669_v24, %v659_v31  ;;  %v1456_v34 = vpop.f32.mrb[2].mxu0  ;;  %v1472_v35 = vpop.f32.mrb[2].mxu1 }
  0xfd   : > { %v869_v36 = vadd.f32 %v1674_v26, %v830_v28  ;;  %v885_v37 = vadd.f32 %v1674_v26, %v846_v29  ;;  %v831_v38 = vmul.f32 %v1456_v34, %v1669_v24  ;;  %v847_v39 = vmul.f32 %v1472_v35, %v1669_v24  ;;  %v598_v40 = vpop.f32.mrb[3].mxu0  ;;  %v662_v41 = vpop.f32.mrb[3].mxu1 }
  0xfe   : > { %v867_v42 = vadd.f32 %v1674_v26, %v828_v32  ;;  %v883_v43 = vadd.f32 %v1674_v26, %v844_v33  ;;  %v829_v44 = vmul.f32 %v1669_v24, %v598_v40  ;;  %v845_v45 = vmul.f32 %v1669_v24, %v662_v41 }
  0xff   : > { %v870_v46 = vadd.f32 %v1674_v26, %v831_v38  ;;  %v886_v47 = vadd.f32 %v1674_v26, %v847_v39  ;;  %v901_v50 = vmax.f32 %v869_v36, 0.0  ;;  %v917_v51 = vmax.f32 %v885_v37, 0.0 }
 0x100   : > { %v868_v48 = vadd.f32 %v1674_v26, %v829_v44  ;;  %v884_v49 = vadd.f32 %v1674_v26, %v845_v45  ;;  %v899_v54 = vmax.f32 %v867_v42, 0.0  ;;  %v915_v55 = vmax.f32 %v883_v43, 0.0 }
 0x101   : > { %v902_v52 = vmax.f32 %v870_v46, 0.0  ;;  %v918_v53 = vmax.f32 %v886_v47, 0.0 }
 0x102   : > { %v900_v56 = vmax.f32 %v868_v48, 0.0  ;;  %v916_v57 = vmax.f32 %v884_v49, 0.0  ;;  %v1459_v58 = vpop.f32.mrb[4].mxu0  ;;  %v1475_v59 = vpop.f32.mrb[4].mxu1 }
 0x103   : > { %v1326_v60 = vpack.c.bf16 %v902_v52, %v901_v50  ;;  %v1366_v61 = vpack.c.bf16 %v918_v53, %v917_v51  ;;  %v834_v62 = vmul.f32 %v1459_v58, %v1669_v24  ;;  %v850_v63 = vmul.f32 %v1475_v59, %v1669_v24  ;;  %v611_v0 = vpop.f32.mrb[5].mxu0  ;;  %v675_v1 = vpop.f32.mrb[5].mxu1 }
 0x104   : > { %v1321_v2 = vpack.c.bf16 %v900_v56, %v899_v54  ;;  %v1361_v3 = vpack.c.bf16 %v916_v57, %v915_v55  ;;  %v832_v4 = vmul.f32 %v1669_v24, %v611_v0  ;;  %v848_v5 = vmul.f32 %v1669_v24, %v675_v1  ;;  %v1460_v6 = vpop.f32.mrb[6].mxu0  ;;  %v1476_v7 = vpop.f32.mrb[6].mxu1 }
 0x105   : > { %1398 = vst [vmem:[%s1697_s24 + $0x8] sm:$0xff] %v1326_v60   ;;  %1406 = vst [vmem:[%s1697_s24 + $0x48] sm:$0xff] %v1366_v61   ;;  %v873_v8 = vadd.f32 %v1674_v26, %v834_v62  ;;  %v889_v9 = vadd.f32 %v1674_v26, %v850_v63  ;;  %v835_v10 = vmul.f32 %v1460_v6, %v1669_v24  ;;  %v614_v12 = vpop.f32.mrb[7].mxu0  ;;  %v678_v13 = vpop.f32.mrb[7].mxu1 }
 0x106   : > { %v851_v11 = vmul.f32 %v1476_v7, %v1669_v24  ;;  %1322 = vst [vmem:[%s1697_s24] sm:$0xff] %v1321_v2   ;;  %1405 = vst [vmem:[%s1697_s24 + $0x40] sm:$0xff] %v1361_v3   ;;  %v871_v14 = vadd.f32 %v1674_v26, %v832_v4  ;;  %v887_v15 = vadd.f32 %v1674_v26, %v848_v5 }
 0x107   : > { %v833_v16 = vmul.f32 %v1669_v24, %v614_v12  ;;  %v849_v17 = vmul.f32 %v1669_v24, %v678_v13  ;;  %v874_v18 = vadd.f32 %v1674_v26, %v835_v10  ;;  %v905_v22 = vmax.f32 %v873_v8, 0.0 }
 0x108   : > { %v890_v19 = vadd.f32 %v1674_v26, %v851_v11  ;;  %v921_v23 = vmax.f32 %v889_v9, 0.0  ;;  %v903_v28 = vmax.f32 %v871_v14, 0.0  ;;  %v919_v29 = vmax.f32 %v887_v15, 0.0 }
 0x109   : > { %v872_v20 = vadd.f32 %v1674_v26, %v833_v16  ;;  %v888_v21 = vadd.f32 %v1674_v26, %v849_v17  ;;  %v906_v25 = vmax.f32 %v874_v18, 0.0 }
 0x10a   : > { %v922_v27 = vmax.f32 %v890_v19, 0.0  ;;  %v1463_v32 = vpop.f32.mrb[8].mxu0  ;;  %v1479_v33 = vpop.f32.mrb[8].mxu1 }
 0x10b   : > { %v904_v30 = vmax.f32 %v872_v20, 0.0  ;;  %v920_v31 = vmax.f32 %v888_v21, 0.0  ;;  %v1336_v34 = vpack.c.bf16 %v906_v25, %v905_v22  ;;  %v838_v36 = vmul.f32 %v1463_v32, %v1669_v24  ;;  %v627_v38 = vpop.f32.mrb[9].mxu0  ;;  %v691_v39 = vpop.f32.mrb[9].mxu1 }
 0x10c   : > { %v1376_v35 = vpack.c.bf16 %v922_v27, %v921_v23  ;;  %v854_v37 = vmul.f32 %v1479_v33, %v1669_v24  ;;  %v836_v42 = vmul.f32 %v1669_v24, %v627_v38  ;;  %v852_v43 = vmul.f32 %v1669_v24, %v691_v39  ;;  %v1464_v44 = vpop.f32.mrb[10].mxu0  ;;  %v1480_v45 = vpop.f32.mrb[10].mxu1 }
 0x10d   : > { %v1331_v40 = vpack.c.bf16 %v904_v30, %v903_v28  ;;  %v1371_v41 = vpack.c.bf16 %v920_v31, %v919_v29  ;;  %1400 = vst [vmem:[%s1697_s24 + $0x18] sm:$0xff] %v1336_v34   ;;  %v877_v46 = vadd.f32 %v1674_v26, %v838_v36  ;;  %v839_v48 = vmul.f32 %v1464_v44, %v1669_v24  ;;  %v630_v50 = vpop.f32.mrb[11].mxu0  ;;  %v694_v51 = vpop.f32.mrb[11].mxu1 }
 0x10e   : > { %1408 = vst [vmem:[%s1697_s24 + $0x58] sm:$0xff] %v1376_v35   ;;  %v893_v47 = vadd.f32 %v1674_v26, %v854_v37  ;;  %v855_v49 = vmul.f32 %v1480_v45, %v1669_v24  ;;  %v875_v52 = vadd.f32 %v1674_v26, %v836_v42  ;;  %v891_v53 = vadd.f32 %v1674_v26, %v852_v43 }
 0x10f   : > { %1399 = vst [vmem:[%s1697_s24 + $0x10] sm:$0xff] %v1331_v40   ;;  %1407 = vst [vmem:[%s1697_s24 + $0x50] sm:$0xff] %v1371_v41   ;;  %v837_v54 = vmul.f32 %v1669_v24, %v630_v50  ;;  %v853_v55 = vmul.f32 %v1669_v24, %v694_v51  ;;  %v878_v56 = vadd.f32 %v1674_v26, %v839_v48  ;;  %v909_v60 = vmax.f32 %v877_v46, 0.0 }
 0x110   : > { %v894_v57 = vadd.f32 %v1674_v26, %v855_v49  ;;  %v925_v61 = vmax.f32 %v893_v47, 0.0  ;;  %v907_v0 = vmax.f32 %v875_v52, 0.0  ;;  %v923_v1 = vmax.f32 %v891_v53, 0.0 }
 0x111   : > { %v876_v58 = vadd.f32 %v1674_v26, %v837_v54  ;;  %v892_v59 = vadd.f32 %v1674_v26, %v853_v55  ;;  %v910_v62 = vmax.f32 %v878_v56, 0.0 }
 0x112   : > { %v926_v63 = vmax.f32 %v894_v57, 0.0  ;;  %v1467_v4 = vpop.f32.mrb[12].mxu0  ;;  %v1483_v5 = vpop.f32.mrb[12].mxu1 }
 0x113   : > { %v908_v2 = vmax.f32 %v876_v58, 0.0  ;;  %v924_v3 = vmax.f32 %v892_v59, 0.0  ;;  %v1346_v6 = vpack.c.bf16 %v910_v62, %v909_v60  ;;  %v842_v8 = vmul.f32 %v1467_v4, %v1669_v24  ;;  %v643_v10 = vpop.f32.mrb[13].mxu0  ;;  %v707_v11 = vpop.f32.mrb[13].mxu1 }
 0x114   : > { %v1386_v7 = vpack.c.bf16 %v926_v63, %v925_v61  ;;  %v858_v9 = vmul.f32 %v1483_v5, %v1669_v24  ;;  %v840_v14 = vmul.f32 %v1669_v24, %v643_v10  ;;  %v856_v15 = vmul.f32 %v1669_v24, %v707_v11  ;;  %v1468_v16 = vpop.f32.mrb[14].mxu0  ;;  %v1484_v17 = vpop.f32.mrb[14].mxu1 }
 0x115   : > { %v1341_v12 = vpack.c.bf16 %v908_v2, %v907_v0  ;;  %v1381_v13 = vpack.c.bf16 %v924_v3, %v923_v1  ;;  %1402 = vst [vmem:[%s1697_s24 + $0x28] sm:$0xff] %v1346_v6   ;;  %v881_v18 = vadd.f32 %v1674_v26, %v842_v8  ;;  %v843_v20 = vmul.f32 %v1468_v16, %v1669_v24  ;;  %v646_v22 = vpop.f32.mrb[15].mxu0  ;;  %v710_v23 = vpop.f32.mrb[15].mxu1 }
 0x116   : > { %1410 = vst [vmem:[%s1697_s24 + $0x68] sm:$0xff] %v1386_v7   ;;  %v897_v19 = vadd.f32 %v1674_v26, %v858_v9  ;;  %v859_v21 = vmul.f32 %v1484_v17, %v1669_v24  ;;  %v879_v25 = vadd.f32 %v1674_v26, %v840_v14  ;;  %v895_v27 = vadd.f32 %v1674_v26, %v856_v15 }
 0x117   : > { %1401 = vst [vmem:[%s1697_s24 + $0x20] sm:$0xff] %v1341_v12   ;;  %1409 = vst [vmem:[%s1697_s24 + $0x60] sm:$0xff] %v1381_v13   ;;  %v841_v28 = vmul.f32 %v1669_v24, %v646_v22  ;;  %v857_v29 = vmul.f32 %v1669_v24, %v710_v23  ;;  %v882_v30 = vadd.f32 %v1674_v26, %v843_v20  ;;  %v913_v34 = vmax.f32 %v881_v18, 0.0 }
 0x118   : > { %v898_v31 = vadd.f32 %v1674_v26, %v859_v21  ;;  %v929_v35 = vmax.f32 %v897_v19, 0.0  ;;  %v911_v38 = vmax.f32 %v879_v25, 0.0  ;;  %v927_v39 = vmax.f32 %v895_v27, 0.0 }
 0x119   : > { %v880_v32 = vadd.f32 %v1674_v26, %v841_v28  ;;  %v896_v33 = vadd.f32 %v1674_v26, %v857_v29  ;;  %v914_v36 = vmax.f32 %v882_v30, 0.0 }
 0x11a   : > { %v930_v37 = vmax.f32 %v898_v31, 0.0 }
 0x11b   : > { %v912_v40 = vmax.f32 %v880_v32, 0.0  ;;  %v928_v24 = vmax.f32 %v896_v33, 0.0  ;;  %v1356_v41 = vpack.c.bf16 %v914_v36, %v913_v34 }
 0x11c   : > { %v1396_v42 = vpack.c.bf16 %v930_v37, %v929_v35 }
 0x11d   : > { %v1351_v43 = vpack.c.bf16 %v912_v40, %v911_v38  ;;  %v1391_v44 = vpack.c.bf16 %v928_v24, %v927_v39  ;;  %1404 = vst [vmem:[%s1697_s24 + $0x38] sm:$0xff] %v1356_v41  }
 0x11e   : > { %1412 = vst [vmem:[%s1697_s24 + $0x78] sm:$0xff] %v1396_v42  }
 0x11f   : > { %1403 = vst [vmem:[%s1697_s24 + $0x30] sm:$0xff] %v1351_v43   ;;  %1411 = vst [vmem:[%s1697_s24 + $0x70] sm:$0xff] %v1391_v44  }
 0x120 PF: > { %s14_s17 = sadd.s32 1, %s1571_s17   ;;  %s1777_s15 = smov %s1567_s16 }
 0x121   : > { %p11_p5 = scmp.ge.s32.totalorder %s14_s17, 4   ;;  %s1778_s16 = smov %s1780_s18 }
 0x123   :  { %13 = sbr.rel (!%p11_p5) target bundleno = 2 (0x2), region = 83 }

// kernel: basic_block_forward.3
= control target key start
LH: loop header
LB: loop body
LE: loop exit
PB: predicated region body
PF: predicated region fallthrough
CT: control target
= control target key end

     0   :  { %s1589_s21 = smov 0   ;;  %s1591_s22 = smov 0   ;;  %s1855_s0 = inlined_call_operand.vmem [shape: bf16[512,128], index: 0, kind: input, shape index: {}]   ;;  %s1856_s1 = inlined_call_operand.vmem [shape: bf16[128,128], index: 1, kind: input, shape index: {}]   ;;  %s1857_s2 = inlined_call_operand.vmem [shape: f32[1,128], index: 2, kind: input, shape index: {}]   ;;  %s1858_s3 = inlined_call_operand.vmem [shape: f32[1,128], index: 3, kind: input, shape index: {}]   ;;  %s1859_s4 = inlined_call_operand.vmem [shape: f32[512,128], index: 4, kind: input, shape index: {}]   ;;  %s1860_s5 = inlined_call_operand.vmem [shape: f32[512,128], index: 5, kind: output, shape index: {0}]   ;;  %s1861_s6 = inlined_call_operand.vmem [shape: f32[512,128], index: 6, kind: output, shape index: {1}]  }
   0x1   :  { %s1593_s23 = smov 0  }
   0x2 LB: > { %s36_s24 = sadd.s32 1, %s1548_s22  ;;  %p1357_p0 = scmp.ge.s32.totalorder %s1552_s23, 1  ;;  %s1552_s23 = sphi %s1593_s23, %s17_s23   ;;  %s1548_s22 = sphi %s1591_s22, %s1863_s22   ;;  %s1544_s21 = sphi %s1589_s21, %s1862_s21  }
   0x3   : > { %p38_p1 = scmp.ge.s32.totalorder %s36_s24, 2  ;;  %p292_p2 = scmp.lt.s32.totalorder %s1552_s23, 3 }
   0x5   : > { %s1865_s24 = smov (%p38_p1, %s36_s24), 0  ;;  %p293_p3 = pnand %p1357_p0, %p292_p2 }
   0x6   : > { %v1506_v0 = vld [vmem:[%s1856_s1] sm:$0xff] (!%p293_p3)   ;;  %s1358_s27 = sshll.u32 (!%p293_p3), %s1544_s21, 5  ;;  %v1507_v1 = vld [vmem:[%s1856_s1 + $0x8] sm:$0xff] (!%p293_p3)   ;;  %v1508_v2 = vld [vmem:[%s1856_s1 + $0x10] sm:$0xff] (!%p293_p3)  }
   0x7   : > { %296 = sbr.rel (%p293_p3) target bundleno = 292 (0x124), region = 40  ;;  %p359_p4 = scmp.lt.s32.totalorder (!%p293_p3), %s1358_s27, 63  ;;  %1418 = vmatprep.subr.bf16.mxu0 (!%p293_p3), %v1506_v0  ;;  %1466 = vmatprep.subr.bf16.mxu1 (!%p293_p3), %v1506_v0  ;;  %v1509_v3 = vld [vmem:[%s1856_s1 + $0x18] sm:$0xff] (!%p293_p3)   ;;  %v1510_v6 = vld [vmem:[%s1856_s1 + $0x20] sm:$0xff] (!%p293_p3)   ;;  %v1511_v7 = vld [vmem:[%s1856_s1 + $0x28] sm:$0xff] (!%p293_p3)  }
   0x8   : > { %1419 = vmatpush3.bf16.msra.mxu0 (!%p293_p3), %v1506_v0  ;;  %1474 = vmatpush3.bf16.msra.mxu1 (!%p293_p3), %v1506_v0  ;;  %v1512_v8 = vld [vmem:[%s1856_s1 + $0x30] sm:$0xff] (!%p293_p3)   ;;  %v1513_v9 = vld [vmem:[%s1856_s1 + $0x38] sm:$0xff] (!%p293_p3)   ;;  %v1661_v24 = vld [vmem:[%s1857_s2] ss:$0 sm:$0xff] (!%p293_p3) }
   0x9   : > { %1420 = vmatprep.subr.bf16.mxu0 (!%p293_p3), %v1507_v1  ;;  %1467 = vmatprep.subr.bf16.mxu1 (!%p293_p3), %v1507_v1  ;;  %v1672_v26 = vld [vmem:[%s1858_s3] ss:$0 sm:$0xff] (!%p293_p3) }
   0xc   : > { %1421 = vmatpush3.bf16.msra.mxu0 (!%p293_p3), %v1507_v1  ;;  %1475 = vmatpush3.bf16.msra.mxu1 (!%p293_p3), %v1507_v1 }
   0xd   : > { %1422 = vmatprep.subr.bf16.mxu0 (!%p293_p3), %v1508_v2  ;;  %1468 = vmatprep.subr.bf16.mxu1 (!%p293_p3), %v1508_v2 }
   0xe   : > { %s1867_s27 = smov (!%p359_p4, %s1358_s27), 63 }
   0xf   : > { %s1359_s8 = sshll.u32 %s1867_s27, 2  ;;  %s1656_s25 = sshll.u32 %s1867_s27, 3 }
  0x10   : > { %s1622_s11 = scalar_lea.vmem %s1855_s0, %s1359_s8  ;;  %1423 = vmatpush3.bf16.msra.mxu0 %v1508_v2  ;;  %1476 = vmatpush3.bf16.msra.mxu1 %v1508_v2  ;;  %s1667_s7 = scalar_lea.vmem %s1859_s4, %s1656_s25 }
  0x11   : > { %v1514_v4 = vld [vmem:[%s1622_s11] sm:$0xff]   ;;  %1424 = vmatprep.subr.bf16.mxu0 %v1509_v3  ;;  %1469 = vmatprep.subr.bf16.mxu1 %v1509_v3  ;;  %v1516_v10 = vld [vmem:[%s1622_s11 + $0x8] sm:$0xff]   ;;  %v1518_v12 = vld [vmem:[%s1622_s11 + $0x10] sm:$0xff]   ;;  %s1706_s14 = scalar_lea.vmem %s1860_s5, %s1656_s25 }
  0x12   : > { %v1515_v5 = vld [vmem:[%s1622_s11 + $0x40] sm:$0xff]   ;;  %1434 = vmatprep.mubr.bf16.mxu0 %v1514_v4  ;;  %v1517_v11 = vld [vmem:[%s1622_s11 + $0x48] sm:$0xff]   ;;  %v1519_v13 = vld [vmem:[%s1622_s11 + $0x50] sm:$0xff]  }
  0x13   : > { %1450 = vmatprep.mubr.bf16.mxu1 %v1515_v5  ;;  %v1520_v14 = vld [vmem:[%s1622_s11 + $0x18] sm:$0xff]   ;;  %v1522_v16 = vld [vmem:[%s1622_s11 + $0x20] sm:$0xff]   ;;  %v1524_v18 = vld [vmem:[%s1622_s11 + $0x28] sm:$0xff]  }
  0x14   : > { %1425 = vmatpush3.bf16.msra.mxu0 %v1509_v3  ;;  %1477 = vmatpush3.bf16.msra.mxu1 %v1509_v3  ;;  %v1521_v15 = vld [vmem:[%s1622_s11 + $0x58] sm:$0xff]   ;;  %v1523_v17 = vld [vmem:[%s1622_s11 + $0x60] sm:$0xff]   ;;  %v1525_v19 = vld [vmem:[%s1622_s11 + $0x68] sm:$0xff]  }
  0x15   : > { %1426 = vmatprep.subr.bf16.mxu0 %v1510_v6  ;;  %1470 = vmatprep.subr.bf16.mxu1 %v1510_v6  ;;  %v1526_v20 = vld [vmem:[%s1622_s11 + $0x30] sm:$0xff]   ;;  %v1528_v22 = vld [vmem:[%s1622_s11 + $0x38] sm:$0xff]   ;;  %v1008_v40 = vld [vmem:[%s1667_s7] sm:$0xff] }
  0x16   : > { %v1527_v21 = vld [vmem:[%s1622_s11 + $0x70] sm:$0xff]   ;;  %v1529_v23 = vld [vmem:[%s1622_s11 + $0x78] sm:$0xff]   ;;  %v1024_v41 = vld [vmem:[%s1667_s7 + $0x80] sm:$0xff]  ;;  %s1690_s11 = scalar_lea.vmem %s1861_s6, %s1656_s25 }
  0x17   : > { %v1010_v32 = vld [vmem:[%s1667_s7 + $0x10] sm:$0xff]  ;;  %v1011_v48 = vld [vmem:[%s1667_s7 + $0x18] sm:$0xff]  ;;  %v1009_v56 = vld [vmem:[%s1667_s7 + $0x8] sm:$0xff] }
  0x18   : > { %1427 = vmatpush3.bf16.msra.mxu0 %v1510_v6  ;;  %1478 = vmatpush3.bf16.msra.mxu1 %v1510_v6  ;;  %v1026_v33 = vld [vmem:[%s1667_s7 + $0x90] sm:$0xff]  ;;  %v1027_v49 = vld [vmem:[%s1667_s7 + $0x98] sm:$0xff]  ;;  %v1025_v57 = vld [vmem:[%s1667_s7 + $0x88] sm:$0xff] }
  0x19   : > { %1428 = vmatprep.subr.bf16.mxu0 %v1511_v7  ;;  %1471 = vmatprep.subr.bf16.mxu1 %v1511_v7 }
  0x1c   : > { %1429 = vmatpush3.bf16.msra.mxu0 %v1511_v7  ;;  %1479 = vmatpush3.bf16.msra.mxu1 %v1511_v7 }
  0x1d   : > { %1430 = vmatprep.subr.bf16.mxu0 %v1512_v8  ;;  %1472 = vmatprep.subr.bf16.mxu1 %v1512_v8 }
  0x20   : > { %1431 = vmatpush3.bf16.msra.mxu0 %v1512_v8  ;;  %1480 = vmatpush3.bf16.msra.mxu1 %v1512_v8 }
  0x21   : > { %1432 = vmatprep.subr.bf16.mxu0 %v1513_v9  ;;  %1473 = vmatprep.subr.bf16.mxu1 %v1513_v9 }
  0x24   : > { %1433 = vmatpush3.bf16.msra.mxu0 %v1513_v9  ;;  %1481 = vmatpush3.bf16.msra.mxu1 %v1513_v9 }
  0x27   : > { %1435 = vmatmul.mubr.bf16.vlgmr.msra.gmra.mrb[0].mxu0 %v1516_v10  ;;  %1451 = vmatmul.mubr.bf16.vlgmr.msra.gmra.mrb[0].mxu1 %v1517_v11 }
  0x28   : > { %1438 = vmatprep.mubr.bf16.mxu0 %v1518_v12  ;;  %1454 = vmatprep.mubr.bf16.mxu1 %v1519_v13 }
  0x2f   : > { %1439 = vmatmul.mubr.bf16.gmra.mrb[4].mxu0 %v1520_v14  ;;  %1455 = vmatmul.mubr.bf16.gmra.mrb[4].mxu1 %v1521_v15 }
  0x30   : > { %1442 = vmatprep.mubr.bf16.mxu0 %v1522_v16  ;;  %1458 = vmatprep.mubr.bf16.mxu1 %v1523_v17  ;;  %v1014_v16 = vld [vmem:[%s1667_s7 + $0x30] sm:$0xff] }
  0x31   : > { %v1030_v17 = vld [vmem:[%s1667_s7 + $0xb0] sm:$0xff] }
  0x37   : > { %1443 = vmatmul.mubr.bf16.gmra.mrb[8].mxu0 %v1524_v18  ;;  %1459 = vmatmul.mubr.bf16.gmra.mrb[8].mxu1 %v1525_v19 }
  0x38   : > { %1446 = vmatprep.mubr.bf16.mxu0 %v1526_v20  ;;  %1462 = vmatprep.mubr.bf16.mxu1 %v1527_v21 }
  0x3f   : > { %1447 = vmatmul.mubr.bf16.gmra.mrb[12].mxu0 %v1528_v22  ;;  %1463 = vmatmul.mubr.bf16.gmra.mrb[12].mxu1 %v1529_v23 }
  0xfa   : > { %v1436_v25 = vpop.f32.mrb[0].mxu0  ;;  %v1452_v27 = vpop.f32.mrb[0].mxu1 }
  0xfb   : > { %v939_v28 = vmul.f32 %v1436_v25, %v1661_v24  ;;  %v955_v29 = vmul.f32 %v1452_v27, %v1661_v24  ;;  %v704_v30 = vpop.f32.mrb[1].mxu0  ;;  %v768_v31 = vpop.f32.mrb[1].mxu1  ;;  %v1012_v25 = vld [vmem:[%s1667_s7 + $0x20] sm:$0xff] }
  0xfc   : > { %v937_v34 = vmul.f32 %v1661_v24, %v704_v30  ;;  %v953_v35 = vmul.f32 %v1661_v24, %v768_v31  ;;  %v1437_v36 = vpop.f32.mrb[2].mxu0  ;;  %v1453_v37 = vpop.f32.mrb[2].mxu1  ;;  %v1028_v27 = vld [vmem:[%s1667_s7 + $0xa0] sm:$0xff] }
  0xfd   : > { %v978_v38 = vadd.f32 %v1672_v26, %v939_v28  ;;  %v994_v39 = vadd.f32 %v1672_v26, %v955_v29  ;;  %v940_v42 = vmul.f32 %v1437_v36, %v1661_v24  ;;  %v956_v43 = vmul.f32 %v1453_v37, %v1661_v24  ;;  %v707_v44 = vpop.f32.mrb[3].mxu0  ;;  %v771_v45 = vpop.f32.mrb[3].mxu1 }
  0xfe   : > { %v976_v46 = vadd.f32 %v1672_v26, %v937_v34  ;;  %v992_v47 = vadd.f32 %v1672_v26, %v953_v35  ;;  %v938_v50 = vmul.f32 %v1661_v24, %v707_v44  ;;  %v954_v51 = vmul.f32 %v1661_v24, %v771_v45  ;;  %v1015_v34 = vld [vmem:[%s1667_s7 + $0x38] sm:$0xff] }
  0xff   : > { %v1042_v52 = vadd.f32 %v1010_v32, %v978_v38  ;;  %v1058_v53 = vadd.f32 %v1026_v33, %v994_v39  ;;  %v979_v54 = vadd.f32 %v1672_v26, %v940_v42  ;;  %v995_v55 = vadd.f32 %v1672_v26, %v956_v43  ;;  %v1031_v35 = vld [vmem:[%s1667_s7 + $0xb8] sm:$0xff]  ;;  %v1013_v42 = vld [vmem:[%s1667_s7 + $0x28] sm:$0xff] }
 0x100   : > { %v1040_v58 = vadd.f32 %v1008_v40, %v976_v46  ;;  %v1056_v59 = vadd.f32 %v1024_v41, %v992_v47  ;;  %v977_v60 = vadd.f32 %v1672_v26, %v938_v50  ;;  %v993_v61 = vadd.f32 %v1672_v26, %v954_v51  ;;  %v1029_v43 = vld [vmem:[%s1667_s7 + $0xa8] sm:$0xff] }
 0x101   : > { %1074 = vst [vmem:[%s1690_s11 + $0x10] sm:$0xff] %v1042_v52  ;;  %v1106_v62 = vmax.f32 %v1042_v52, 0.0  ;;  %1090 = vst [vmem:[%s1690_s11 + $0x90] sm:$0xff] %v1058_v53  ;;  %v1122_v63 = vmax.f32 %v1058_v53, 0.0  ;;  %v1043_v0 = vadd.f32 %v1011_v48, %v979_v54  ;;  %v1059_v1 = vadd.f32 %v1027_v49, %v995_v55 }
 0x102   : > { %1072 = vst [vmem:[%s1690_s11] sm:$0xff] %v1040_v58  ;;  %v1104_v2 = vmax.f32 %v1040_v58, 0.0  ;;  %1088 = vst [vmem:[%s1690_s11 + $0x80] sm:$0xff] %v1056_v59  ;;  %v1120_v3 = vmax.f32 %v1056_v59, 0.0  ;;  %v1041_v4 = vadd.f32 %v1009_v56, %v977_v60  ;;  %v1057_v5 = vadd.f32 %v1025_v57, %v993_v61  ;;  %v1440_v6 = vpop.f32.mrb[4].mxu0  ;;  %v1456_v7 = vpop.f32.mrb[4].mxu1 }
 0x103   : > { %1138 = vst [vmem:[%s1706_s14 + $0x10] sm:$0xff] %v1106_v62  ;;  %1154 = vst [vmem:[%s1706_s14 + $0x90] sm:$0xff] %v1122_v63  ;;  %v1107_v8 = vmax.f32 %v1043_v0, 0.0  ;;  %v1123_v9 = vmax.f32 %v1059_v1, 0.0  ;;  %v943_v10 = vmul.f32 %v1440_v6, %v1661_v24  ;;  %v959_v11 = vmul.f32 %v1456_v7, %v1661_v24  ;;  %v720_v12 = vpop.f32.mrb[5].mxu0  ;;  %v784_v13 = vpop.f32.mrb[5].mxu1 }
 0x104   : > { %1075 = vst [vmem:[%s1690_s11 + $0x18] sm:$0xff] %v1043_v0  ;;  %1091 = vst [vmem:[%s1690_s11 + $0x98] sm:$0xff] %v1059_v1  ;;  %v1105_v14 = vmax.f32 %v1041_v4, 0.0  ;;  %v1121_v15 = vmax.f32 %v1057_v5, 0.0  ;;  %v941_v18 = vmul.f32 %v1661_v24, %v720_v12  ;;  %v957_v19 = vmul.f32 %v1661_v24, %v784_v13  ;;  %v1441_v20 = vpop.f32.mrb[6].mxu0  ;;  %v1457_v21 = vpop.f32.mrb[6].mxu1 }
 0x105   : > { %1136 = vst [vmem:[%s1706_s14] sm:$0xff] %v1104_v2  ;;  %1152 = vst [vmem:[%s1706_s14 + $0x80] sm:$0xff] %v1120_v3  ;;  %v982_v22 = vadd.f32 %v1672_v26, %v943_v10  ;;  %v998_v23 = vadd.f32 %v1672_v26, %v959_v11  ;;  %v944_v28 = vmul.f32 %v1441_v20, %v1661_v24  ;;  %v723_v30 = vpop.f32.mrb[7].mxu0  ;;  %v787_v31 = vpop.f32.mrb[7].mxu1  ;;  %v1018_v2 = vld [vmem:[%s1667_s7 + $0x50] sm:$0xff]  ;;  %v1016_v10 = vld [vmem:[%s1667_s7 + $0x40] sm:$0xff] }
 0x106   : > { %1073 = vst [vmem:[%s1690_s11 + $0x8] sm:$0xff] %v1041_v4  ;;  %1089 = vst [vmem:[%s1690_s11 + $0x88] sm:$0xff] %v1057_v5  ;;  %v960_v29 = vmul.f32 %v1457_v21, %v1661_v24  ;;  %v980_v32 = vadd.f32 %v1672_v26, %v941_v18  ;;  %v996_v33 = vadd.f32 %v1672_v26, %v957_v19  ;;  %v1034_v3 = vld [vmem:[%s1667_s7 + $0xd0] sm:$0xff]  ;;  %v1032_v11 = vld [vmem:[%s1667_s7 + $0xc0] sm:$0xff] }
 0x107   : > { %1139 = vst [vmem:[%s1706_s14 + $0x18] sm:$0xff] %v1107_v8  ;;  %1155 = vst [vmem:[%s1706_s14 + $0x98] sm:$0xff] %v1123_v9  ;;  %v942_v36 = vmul.f32 %v1661_v24, %v723_v30  ;;  %v958_v37 = vmul.f32 %v1661_v24, %v787_v31  ;;  %v1046_v38 = vadd.f32 %v1014_v16, %v982_v22  ;;  %v1019_v18 = vld [vmem:[%s1667_s7 + $0x58] sm:$0xff] }
 0x108   : > { %1137 = vst [vmem:[%s1706_s14 + $0x8] sm:$0xff] %v1105_v14  ;;  %1153 = vst [vmem:[%s1706_s14 + $0x88] sm:$0xff] %v1121_v15  ;;  %v1062_v39 = vadd.f32 %v1030_v17, %v998_v23  ;;  %v983_v40 = vadd.f32 %v1672_v26, %v944_v28  ;;  %v999_v41 = vadd.f32 %v1672_v26, %v960_v29  ;;  %v1035_v19 = vld [vmem:[%s1667_s7 + $0xd8] sm:$0xff]  ;;  %v1017_v28 = vld [vmem:[%s1667_s7 + $0x48] sm:$0xff] }
 0x109   : > { %v1044_v44 = vadd.f32 %v1012_v25, %v980_v32  ;;  %v1060_v45 = vadd.f32 %v1028_v27, %v996_v33  ;;  %v981_v46 = vadd.f32 %v1672_v26, %v942_v36  ;;  %v997_v47 = vadd.f32 %v1672_v26, %v958_v37  ;;  %1078 = vst [vmem:[%s1690_s11 + $0x30] sm:$0xff] %v1046_v38  ;;  %v1033_v29 = vld [vmem:[%s1667_s7 + $0xc8] sm:$0xff] }
 0x10a   : > { %v1110_v48 = vmax.f32 %v1046_v38, 0.0  ;;  %1094 = vst [vmem:[%s1690_s11 + $0xb0] sm:$0xff] %v1062_v39  ;;  %v1126_v49 = vmax.f32 %v1062_v39, 0.0  ;;  %v1047_v50 = vadd.f32 %v1015_v34, %v983_v40  ;;  %v1063_v51 = vadd.f32 %v1031_v35, %v999_v41  ;;  %v1444_v56 = vpop.f32.mrb[8].mxu0  ;;  %v1460_v57 = vpop.f32.mrb[8].mxu1 }
 0x10b   : > { %1076 = vst [vmem:[%s1690_s11 + $0x20] sm:$0xff] %v1044_v44  ;;  %v1108_v52 = vmax.f32 %v1044_v44, 0.0  ;;  %1092 = vst [vmem:[%s1690_s11 + $0xa0] sm:$0xff] %v1060_v45  ;;  %v1124_v53 = vmax.f32 %v1060_v45, 0.0  ;;  %v1045_v54 = vadd.f32 %v1013_v42, %v981_v46  ;;  %v1061_v55 = vadd.f32 %v1029_v43, %v997_v47  ;;  %v736_v62 = vpop.f32.mrb[9].mxu0  ;;  %v800_v63 = vpop.f32.mrb[9].mxu1 }
 0x10c   : > { %1142 = vst [vmem:[%s1706_s14 + $0x30] sm:$0xff] %v1110_v48  ;;  %1158 = vst [vmem:[%s1706_s14 + $0xb0] sm:$0xff] %v1126_v49  ;;  %v1111_v58 = vmax.f32 %v1047_v50, 0.0  ;;  %v1127_v59 = vmax.f32 %v1063_v51, 0.0  ;;  %v947_v60 = vmul.f32 %v1444_v56, %v1661_v24  ;;  %v963_v61 = vmul.f32 %v1460_v57, %v1661_v24  ;;  %v1445_v6 = vpop.f32.mrb[10].mxu0  ;;  %v1461_v7 = vpop.f32.mrb[10].mxu1 }
 0x10d   : > { %1079 = vst [vmem:[%s1690_s11 + $0x38] sm:$0xff] %v1047_v50  ;;  %1095 = vst [vmem:[%s1690_s11 + $0xb8] sm:$0xff] %v1063_v51  ;;  %v1109_v0 = vmax.f32 %v1045_v54, 0.0  ;;  %v1125_v1 = vmax.f32 %v1061_v55, 0.0  ;;  %v945_v4 = vmul.f32 %v1661_v24, %v736_v62  ;;  %v961_v5 = vmul.f32 %v1661_v24, %v800_v63  ;;  %v739_v14 = vpop.f32.mrb[11].mxu0  ;;  %v803_v15 = vpop.f32.mrb[11].mxu1 }
 0x10e   : > { %1140 = vst [vmem:[%s1706_s14 + $0x20] sm:$0xff] %v1108_v52  ;;  %1156 = vst [vmem:[%s1706_s14 + $0xa0] sm:$0xff] %v1124_v53  ;;  %v986_v8 = vadd.f32 %v1672_v26, %v947_v60  ;;  %v1002_v9 = vadd.f32 %v1672_v26, %v963_v61  ;;  %v948_v12 = vmul.f32 %v1445_v6, %v1661_v24  ;;  %v1022_v52 = vld [vmem:[%s1667_s7 + $0x70] sm:$0xff]  ;;  %v1020_v60 = vld [vmem:[%s1667_s7 + $0x60] sm:$0xff] }
 0x10f   : > { %1077 = vst [vmem:[%s1690_s11 + $0x28] sm:$0xff] %v1045_v54  ;;  %1093 = vst [vmem:[%s1690_s11 + $0xa8] sm:$0xff] %v1061_v55  ;;  %v964_v13 = vmul.f32 %v1461_v7, %v1661_v24  ;;  %v984_v16 = vadd.f32 %v1672_v26, %v945_v4  ;;  %v1000_v17 = vadd.f32 %v1672_v26, %v961_v5  ;;  %v1038_v53 = vld [vmem:[%s1667_s7 + $0xf0] sm:$0xff]  ;;  %v1036_v61 = vld [vmem:[%s1667_s7 + $0xe0] sm:$0xff] }
 0x110   : > { %1143 = vst [vmem:[%s1706_s14 + $0x38] sm:$0xff] %v1111_v58  ;;  %1159 = vst [vmem:[%s1706_s14 + $0xb8] sm:$0xff] %v1127_v59  ;;  %v946_v20 = vmul.f32 %v1661_v24, %v739_v14  ;;  %v962_v21 = vmul.f32 %v1661_v24, %v803_v15  ;;  %v1050_v22 = vadd.f32 %v1018_v2, %v986_v8  ;;  %v1023_v4 = vld [vmem:[%s1667_s7 + $0x78] sm:$0xff] }
 0x111   : > { %1141 = vst [vmem:[%s1706_s14 + $0x28] sm:$0xff] %v1109_v0  ;;  %1157 = vst [vmem:[%s1706_s14 + $0xa8] sm:$0xff] %v1125_v1  ;;  %v1066_v23 = vadd.f32 %v1034_v3, %v1002_v9  ;;  %v987_v25 = vadd.f32 %v1672_v26, %v948_v12  ;;  %v1003_v27 = vadd.f32 %v1672_v26, %v964_v13  ;;  %v1039_v5 = vld [vmem:[%s1667_s7 + $0xf8] sm:$0xff]  ;;  %v1021_v12 = vld [vmem:[%s1667_s7 + $0x68] sm:$0xff] }
 0x112   : > { %v1048_v30 = vadd.f32 %v1016_v10, %v984_v16  ;;  %v1064_v31 = vadd.f32 %v1032_v11, %v1000_v17  ;;  %v985_v32 = vadd.f32 %v1672_v26, %v946_v20  ;;  %v1001_v33 = vadd.f32 %v1672_v26, %v962_v21  ;;  %1082 = vst [vmem:[%s1690_s11 + $0x50] sm:$0xff] %v1050_v22  ;;  %v1448_v42 = vpop.f32.mrb[12].mxu0  ;;  %v1464_v43 = vpop.f32.mrb[12].mxu1  ;;  %v1037_v13 = vld [vmem:[%s1667_s7 + $0xe8] sm:$0xff] }
 0x113   : > { %v1114_v34 = vmax.f32 %v1050_v22, 0.0  ;;  %1098 = vst [vmem:[%s1690_s11 + $0xd0] sm:$0xff] %v1066_v23  ;;  %v1130_v35 = vmax.f32 %v1066_v23, 0.0  ;;  %v1051_v36 = vadd.f32 %v1019_v18, %v987_v25  ;;  %v1067_v37 = vadd.f32 %v1035_v19, %v1003_v27  ;;  %v752_v48 = vpop.f32.mrb[13].mxu0  ;;  %v816_v49 = vpop.f32.mrb[13].mxu1 }
 0x114   : > { %1080 = vst [vmem:[%s1690_s11 + $0x40] sm:$0xff] %v1048_v30  ;;  %v1112_v38 = vmax.f32 %v1048_v30, 0.0  ;;  %1096 = vst [vmem:[%s1690_s11 + $0xc0] sm:$0xff] %v1064_v31  ;;  %v1128_v39 = vmax.f32 %v1064_v31, 0.0  ;;  %v1049_v40 = vadd.f32 %v1017_v28, %v985_v32  ;;  %v1065_v41 = vadd.f32 %v1033_v29, %v1001_v33  ;;  %v1449_v56 = vpop.f32.mrb[14].mxu0  ;;  %v1465_v57 = vpop.f32.mrb[14].mxu1 }
 0x115   : > { %1146 = vst [vmem:[%s1706_s14 + $0x50] sm:$0xff] %v1114_v34  ;;  %1162 = vst [vmem:[%s1706_s14 + $0xd0] sm:$0xff] %v1130_v35  ;;  %v1115_v44 = vmax.f32 %v1051_v36, 0.0  ;;  %v1131_v45 = vmax.f32 %v1067_v37, 0.0  ;;  %v951_v46 = vmul.f32 %v1448_v42, %v1661_v24  ;;  %v967_v47 = vmul.f32 %v1464_v43, %v1661_v24  ;;  %v755_v0 = vpop.f32.mrb[15].mxu0  ;;  %v819_v1 = vpop.f32.mrb[15].mxu1 }
 0x116   : > { %1083 = vst [vmem:[%s1690_s11 + $0x58] sm:$0xff] %v1051_v36  ;;  %1099 = vst [vmem:[%s1690_s11 + $0xd8] sm:$0xff] %v1067_v37  ;;  %v1113_v50 = vmax.f32 %v1049_v40, 0.0  ;;  %v1129_v51 = vmax.f32 %v1065_v41, 0.0  ;;  %v949_v54 = vmul.f32 %v1661_v24, %v752_v48  ;;  %v965_v55 = vmul.f32 %v1661_v24, %v816_v49 }
 0x117   : > { %1144 = vst [vmem:[%s1706_s14 + $0x40] sm:$0xff] %v1112_v38  ;;  %1160 = vst [vmem:[%s1706_s14 + $0xc0] sm:$0xff] %v1128_v39  ;;  %v990_v58 = vadd.f32 %v1672_v26, %v951_v46  ;;  %v1006_v59 = vadd.f32 %v1672_v26, %v967_v47  ;;  %v952_v62 = vmul.f32 %v1449_v56, %v1661_v24 }
 0x118   : > { %1081 = vst [vmem:[%s1690_s11 + $0x48] sm:$0xff] %v1049_v40  ;;  %1097 = vst [vmem:[%s1690_s11 + $0xc8] sm:$0xff] %v1065_v41  ;;  %v968_v63 = vmul.f32 %v1465_v57, %v1661_v24  ;;  %v988_v2 = vadd.f32 %v1672_v26, %v949_v54  ;;  %v1004_v3 = vadd.f32 %v1672_v26, %v965_v55 }
 0x119   : > { %1147 = vst [vmem:[%s1706_s14 + $0x58] sm:$0xff] %v1115_v44  ;;  %1163 = vst [vmem:[%s1706_s14 + $0xd8] sm:$0xff] %v1131_v45  ;;  %v950_v6 = vmul.f32 %v1661_v24, %v755_v0  ;;  %v966_v7 = vmul.f32 %v1661_v24, %v819_v1  ;;  %v1054_v8 = vadd.f32 %v1022_v52, %v990_v58 }
 0x11a   : > { %1145 = vst [vmem:[%s1706_s14 + $0x48] sm:$0xff] %v1113_v50  ;;  %1161 = vst [vmem:[%s1706_s14 + $0xc8] sm:$0xff] %v1129_v51  ;;  %v1070_v9 = vadd.f32 %v1038_v53, %v1006_v59  ;;  %v991_v10 = vadd.f32 %v1672_v26, %v952_v62  ;;  %v1007_v11 = vadd.f32 %v1672_v26, %v968_v63 }
 0x11b   : > { %v1052_v14 = vadd.f32 %v1020_v60, %v988_v2  ;;  %v1068_v15 = vadd.f32 %v1036_v61, %v1004_v3  ;;  %v989_v16 = vadd.f32 %v1672_v26, %v950_v6  ;;  %v1005_v17 = vadd.f32 %v1672_v26, %v966_v7  ;;  %1086 = vst [vmem:[%s1690_s11 + $0x70] sm:$0xff] %v1054_v8 }
 0x11c   : > { %v1118_v24 = vmax.f32 %v1054_v8, 0.0  ;;  %1102 = vst [vmem:[%s1690_s11 + $0xf0] sm:$0xff] %v1070_v9  ;;  %v1134_v18 = vmax.f32 %v1070_v9, 0.0  ;;  %v1055_v19 = vadd.f32 %v1023_v4, %v991_v10  ;;  %v1071_v20 = vadd.f32 %v1039_v5, %v1007_v11 }
 0x11d   : > { %1084 = vst [vmem:[%s1690_s11 + $0x60] sm:$0xff] %v1052_v14  ;;  %v1116_v21 = vmax.f32 %v1052_v14, 0.0  ;;  %1100 = vst [vmem:[%s1690_s11 + $0xe0] sm:$0xff] %v1068_v15  ;;  %v1132_v22 = vmax.f32 %v1068_v15, 0.0  ;;  %v1053_v23 = vadd.f32 %v1021_v12, %v989_v16  ;;  %v1069_v26 = vadd.f32 %v1037_v13, %v1005_v17 }
 0x11e   : > { %1150 = vst [vmem:[%s1706_s14 + $0x70] sm:$0xff] %v1118_v24  ;;  %1166 = vst [vmem:[%s1706_s14 + $0xf0] sm:$0xff] %v1134_v18  ;;  %v1119_v25 = vmax.f32 %v1055_v19, 0.0  ;;  %v1135_v27 = vmax.f32 %v1071_v20, 0.0 }
 0x11f   : > { %1087 = vst [vmem:[%s1690_s11 + $0x78] sm:$0xff] %v1055_v19  ;;  %1103 = vst [vmem:[%s1690_s11 + $0xf8] sm:$0xff] %v1071_v20  ;;  %v1117_v28 = vmax.f32 %v1053_v23, 0.0  ;;  %v1133_v29 = vmax.f32 %v1069_v26, 0.0 }
 0x120   : > { %1148 = vst [vmem:[%s1706_s14 + $0x60] sm:$0xff] %v1116_v21  ;;  %1164 = vst [vmem:[%s1706_s14 + $0xe0] sm:$0xff] %v1132_v22 }
 0x121   : > { %1085 = vst [vmem:[%s1690_s11 + $0x68] sm:$0xff] %v1053_v23  ;;  %1101 = vst [vmem:[%s1690_s11 + $0xe8] sm:$0xff] %v1069_v26 }
 0x122   : > { %1151 = vst [vmem:[%s1706_s14 + $0x78] sm:$0xff] %v1119_v25  ;;  %1167 = vst [vmem:[%s1706_s14 + $0xf8] sm:$0xff] %v1135_v27 }
 0x123   : > { %1149 = vst [vmem:[%s1706_s14 + $0x68] sm:$0xff] %v1117_v28  ;;  %1165 = vst [vmem:[%s1706_s14 + $0xe8] sm:$0xff] %v1133_v29 }
 0x124 PF: > { %s17_s23 = sadd.s32 1, %s1552_s23   ;;  %s1862_s21 = smov %s1548_s22 }
 0x125   : > { %p14_p5 = scmp.ge.s32.totalorder %s17_s23, 4   ;;  %s1863_s22 = smov %s1865_s24 }
 0x127   :  { %16 = sbr.rel (!%p14_p5) target bundleno = 2 (0x2), region = 102 }

</bundles_post_ra>
